<compile_context>
chip_gen: v5e
topology: v5e:2x2
jax: 0.10.0
libtpu: 0.0.40
codegen_flags: <defaults>
</compile_context>

<pallas_src>
import math
import jax
import jax.numpy as jnp
from jax.experimental import pallas as pl
from jax.experimental.pallas import tpu as pltpu

NUM_CLASSES = 18
IGNORE_INDEX = -100
MAX_TILE_T = 16384   # lane-dense tile width (review: 8192-32768)


def _round_up(x, m):
    return ((x + m - 1) // m) * m


def _compute_class_weights(class_frequencies, num_classes, temperature, scale):
    """Mirror of ClassBalancedLoss._compute_class_weights (host-side glue)."""
    weights = [1.0] * num_classes
    for class_id, freq in class_frequencies.items():
        if 0 <= class_id < num_classes and freq > 0:
            base_weight = 1.0 / math.log(1 + freq)
            weights[class_id] = base_weight ** (1.0 / temperature) * scale
    for i in range(num_classes):
        if i not in class_frequencies:
            weights[i] = scale
    w = jnp.asarray(weights, dtype=jnp.float32)
    w = w * num_classes / jnp.sum(w)
    return w


def _per_class_logp_sum_kernel(logits_ref, targets_ref, out_ref, acc_ref):
    """One (b, t_outer, t_inner) grid step.

    Accumulates sum_t 1[target_t == c] * logp[c, t] into a tile-shaped f32
    scratch; emits per-class totals for this (b, t_outer) slice at the last
    inner step.
    """
    ti = pl.program_id(2)

    @pl.when(ti == 0)
    def _init():
        acc_ref[...] = jnp.zeros_like(acc_ref)

    logp = logits_ref[0].astype(jnp.float32)   # (C, TILE_T); upcast if bf16 input
    tgt = targets_ref[0]                       # (1, TILE_T) int32, padded with ignore_index
    c, tt = logp.shape
    class_ids = jax.lax.broadcasted_iota(jnp.int32, (c, tt), 0)
    match = class_ids == tgt                   # one-hot on sublanes; -100 / garbage lanes never match
    # VPU-only per element: compare + select + add (class weights applied outside).
    acc_ref[...] += jnp.where(match, logp, 0.0)

    @pl.when(ti == pl.num_programs(2) - 1)
    def _finalize():
        sums = jnp.sum(acc_ref[...], axis=-1, keepdims=True)   # (C, 1) per-class totals
        out_ref[...] = sums.reshape(1, 1, c, 1)


def _per_class_logp_sums(logits_bct, targets_bt, ignore_index=IGNORE_INDEX,
                         max_tile_t=MAX_TILE_T):
    """Returns per-class sums of selected log-probs, shape (B, T_outer, C, 1)."""
    b, c, t = logits_bct.shape

    tile_t = min(_round_up(max_tile_t, 128), _round_up(t, 128))
    n_tiles = pl.cdiv(t, tile_t)
    # Give v7x's 2nd TensorCore balanced work when B alone can't (B odd / 1);
    # no-op on single-TC v5e/v6e. Only when it divides the tile count so no
    # block index ever points fully past the logits array.
    t_outer = 2 if (b % 2 == 1 and n_tiles % 2 == 0) else 1
    t_inner = n_tiles // t_outer

    # Pad ONLY the tiny targets array so garbage lanes of a partial edge
    # logits block never match a real class id; the big logits tensor is
    # consumed in place (no extra HBM read+write pass).
    t_pad = n_tiles * tile_t
    targets_bt = targets_bt.astype(jnp.int32)
    if t_pad != t:
        targets_bt = jnp.pad(targets_bt, ((0, 0), (0, t_pad - t)),
                             constant_values=ignore_index)
    targets_b1t = targets_bt.reshape(b, 1, t_pad)

    grid = (b, t_outer, t_inner)
    out = pl.pallas_call(
        _per_class_logp_sum_kernel,
        out_shape=jax.ShapeDtypeStruct((b, t_outer, c, 1), jnp.float32),
        grid_spec=pltpu.PrefetchScalarGridSpec(
            num_scalar_prefetch=0,
            grid=grid,
            in_specs=[
                pl.BlockSpec((1, c, tile_t),
                             lambda bi, to, ti: (bi, 0, to * t_inner + ti)),
                pl.BlockSpec((1, 1, tile_t),
                             lambda bi, to, ti: (bi, 0, to * t_inner + ti)),
            ],
            out_specs=pl.BlockSpec((1, 1, c, 1),
                                   lambda bi, to, ti: (bi, to, 0, 0)),
            scratch_shapes=[pltpu.VMEM((c, tile_t), jnp.float32)],
        ),
        compiler_params=pltpu.CompilerParams(
            dimension_semantics=("parallel", "parallel", "arbitrary"),
            vmem_limit_bytes=32 * 1024 * 1024,   # headroom; ~7 MiB used at TILE_T=16384
        ),
    )(logits_bct, targets_b1t)
    return out


class ScheduledClassBalancedLossPallas:
    """JAX/Pallas port of ScheduledClassBalancedLoss (smoothing=0.0 path)."""

    def __init__(self, class_frequencies, num_classes=NUM_CLASSES, smoothing=0.0,
                 ignore_index=IGNORE_INDEX, temperature=2.0, scale=0.5,
                 schedule_type="accuracy", threshold=0.8, warmup_epochs=10):
        # TODO(synk): label-smoothed path (smoothing > 0) not exercised by defaults; not ported.
        assert smoothing == 0.0
        self.num_classes = num_classes
        self.ignore_index = ignore_index
        self.schedule_type = schedule_type
        self.threshold = threshold
        self.warmup_epochs = warmup_epochs
        self.current_weight_scale = 0.0
        self.weights = _compute_class_weights(class_frequencies, num_classes,
                                              temperature, scale)

    def update_schedule(self, epoch=None, accuracy=None):
        if self.schedule_type == "accuracy" and accuracy is not None:
            if accuracy >= self.threshold:
                self.current_weight_scale = min(1.0, (accuracy - self.threshold) / 0.1)
            else:
                self.current_weight_scale = 0.0
        elif self.schedule_type == "epoch" and epoch is not None:
            if epoch >= self.warmup_epochs:
                self.current_weight_scale = min(1.0, (epoch - self.warmup_epochs) / 10)
            else:
                self.current_weight_scale = 0.0
        elif self.schedule_type == "linear" and epoch is not None:
            self.current_weight_scale = min(1.0, epoch / 50)

    def __call__(self, logits_bct, targets_bt, max_tile_t=MAX_TILE_T):
        # logits_bct: [B, C, T] log-probs (native trainer layout, consumed directly).
        s = float(self.current_weight_scale)
        eff_w = (1.0 - s) + s * self.weights            # blended per-class weight [C]
        per_class = _per_class_logp_sums(logits_bct, targets_bt,
                                         ignore_index=self.ignore_index,
                                         max_tile_t=max_tile_t)   # (B, T_outer, C, 1)
        per_class = jnp.sum(per_class, axis=(0, 1, 3))            # (C,)
        return -jnp.sum(per_class * eff_w)


def _reference_loss(logits_bct, targets_bt, weights, s, ignore_index=IGNORE_INDEX):
    """Plain-JAX reference reproducing the PyTorch semantics (reduction='sum')."""
    c = logits_bct.shape[1]
    logp = jnp.transpose(logits_bct, (0, 2, 1)).reshape(-1, c).astype(jnp.float32)
    t = targets_bt.reshape(-1)
    valid = t != ignore_index
    t_safe = jnp.where(valid, t, 0)
    logp_t = jnp.take_along_axis(logp, t_safe[:, None], axis=1)[:, 0]
    w_t = weights[t_safe]
    standard = jnp.sum(jnp.where(valid, -logp_t, 0.0))
    cb = jnp.sum(jnp.where(valid, -logp_t * w_t, 0.0))
    return (1.0 - s) * standard + s * cb


if __name__ == "__main__":
    # Deterministic synthetic class frequencies (some classes absent on purpose).
    class_frequencies = {0: 12000, 1: 8000, 2: 5000, 3: 2500, 4: 1200, 5: 600,
                         6: 300, 7: 150, 8: 60, 9: 25, 10: 10, 11: 4}

    def run_case(key, B, C, T, max_tile_t):
        k1, k2 = jax.random.split(key)
        raw = jax.random.normal(k1, (B, C, T), dtype=jnp.float32)
        logp = jax.nn.log_softmax(raw, axis=1)                  # [B, C, T] log-probs
        tgt = jax.random.randint(k2, (B, T), 0, C).astype(jnp.int32)
        tgt = tgt.at[0, 0].set(IGNORE_INDEX)                    # exercise ignore_index
        tgt = tgt.at[B - 1, T - 1].set(IGNORE_INDEX)
        loss_mod = ScheduledClassBalancedLossPallas(class_frequencies, num_classes=C)
        case_ok = True
        for acc in (0.5, 0.85, 0.95):        # weight scales 0.0, 0.5, 1.0
            loss_mod.update_schedule(accuracy=acc)
            out = loss_mod(logp, tgt, max_tile_t=max_tile_t)
            jax.block_until_ready(out)
            ref = _reference_loss(logp, tgt, loss_mod.weights,
                                  loss_mod.current_weight_scale)
            case_ok = case_ok and bool(jnp.allclose(out, ref, rtol=1e-4, atol=1e-3))
        return case_ok

    key = jax.random.PRNGKey(0)
    k1, k2, k3 = jax.random.split(key, 3)

    ok = True
    # Primary small case (partial T tile, B even).
    ok = ok and run_case(k1, B=2, C=NUM_CLASSES, T=8, max_tile_t=MAX_TILE_T)
    # Multi-tile "arbitrary" reduction with a partial tail tile.
    ok = ok and run_case(k2, B=2, C=NUM_CLASSES, T=300, max_tile_t=128)
    # Odd batch -> T_outer=2 split across the second "parallel" axis.
    ok = ok and run_case(k3, B=1, C=NUM_CLASSES, T=256, max_tile_t=128)

    print("KERNEL_OK" if ok else "MISMATCH")
</pallas_src>

<mosaic_0001>
module attributes {stable_mosaic.version = 11 : i64} {
  func.func @_per_class_logp_sum_kernel(%arg0: i32, %arg1: i32, %arg2: i32, %arg3: memref<1x18x128xf32, #tpu.memory_space<vmem>>, %arg4: memref<1x1x128xi32, #tpu.memory_space<vmem>>, %arg5: memref<1x1x18x1xf32, #tpu.memory_space<vmem>>, %arg6: memref<18x128xf32, #tpu.memory_space<vmem>>) attributes {dimension_semantics = [#tpu.dimension_semantics<parallel>, #tpu.dimension_semantics<parallel>, #tpu.dimension_semantics<arbitrary>], iteration_bounds = array<i64: 2, 1, 1>, scalar_prefetch = 0 : i64, scratch_operands = 1 : i64, tpu.core_type = #tpu.core_type<tc>, window_params = [{transform_indices = @transform_0, window_bounds = array<i64: 1, 18, 128>}, {transform_indices = @transform_1, window_bounds = array<i64: 1, 1, 128>}, {transform_indices = @transform_2, window_bounds = array<i64: 1, 1, 18, 1>}]} {
    %c0_i32 = arith.constant 0 : i32
    %0 = arith.cmpi eq, %arg2, %c0_i32 : i32
    %1 = arith.extui %0 : i1 to i32
    %c0_i32_0 = arith.constant 0 : i32
    %2 = arith.cmpi ne, %1, %c0_i32_0 : i32
    scf.if %2 {
      %cst_12 = arith.constant 0.000000e+00 : f32
      %18 = vector.broadcast %cst_12 : f32 to vector<18x128xf32>
      %c0_13 = arith.constant 0 : index
      %c0_14 = arith.constant 0 : index
      %19 = vector.load %arg6[%c0_13, %c0_14] : memref<18x128xf32, #tpu.memory_space<vmem>>, vector<18x128xf32>
      tpu.vector_store %arg6[%c0_13, %c0_14], %18 {strides = array<i32>} : memref<18x128xf32, #tpu.memory_space<vmem>>, vector<18x128xf32>,
    } else {
    }
    %c0 = arith.constant 0 : index
    %c0_1 = arith.constant 0 : index
    %c0_2 = arith.constant 0 : index
    %3 = vector.load %arg3[%c0, %c0_1, %c0_2] : memref<1x18x128xf32, #tpu.memory_space<vmem>>, vector<1x18x128xf32>
    %4 = vector.shape_cast %3 : vector<1x18x128xf32> to vector<18x128xf32>
    %c0_3 = arith.constant 0 : index
    %c0_4 = arith.constant 0 : index
    %c0_5 = arith.constant 0 : index
    %5 = vector.load %arg4[%c0_3, %c0_4, %c0_5] : memref<1x1x128xi32, #tpu.memory_space<vmem>>, vector<1x1x128xi32>
    %6 = vector.shape_cast %5 : vector<1x1x128xi32> to vector<1x128xi32>
    %7 = tpu.iota {dimensions = array<i32: 0>} : vector<18x128xi32>
    %8 = vector.broadcast %6 : vector<1x128xi32> to vector<18x128xi32>
    %9 = arith.cmpi eq, %7, %8 : vector<18x128xi32>
    %c0_6 = arith.constant 0 : index
    %c0_7 = arith.constant 0 : index
    %10 = vector.load %arg6[%c0_6, %c0_7] : memref<18x128xf32, #tpu.memory_space<vmem>>, vector<18x128xf32>
    %cst = arith.constant 0.000000e+00 : f32
    %11 = vector.broadcast %cst : f32 to vector<18x128xf32>
    %12 = arith.select %9, %4, %11 : vector<18x128xi1>, vector<18x128xf32>
    %13 = arith.addf %10, %12 : vector<18x128xf32>
    %c0_8 = arith.constant 0 : index
    %c0_9 = arith.constant 0 : index
    %14 = vector.load %arg6[%c0_8, %c0_9] : memref<18x128xf32, #tpu.memory_space<vmem>>, vector<18x128xf32>
    tpu.vector_store %arg6[%c0_8, %c0_9], %13 {strides = array<i32>} : memref<18x128xf32, #tpu.memory_space<vmem>>, vector<18x128xf32>,
    %c0_i32_10 = arith.constant 0 : i32
    %15 = arith.cmpi eq, %arg2, %c0_i32_10 : i32
    %16 = arith.extui %15 : i1 to i32
    %c0_i32_11 = arith.constant 0 : i32
    %17 = arith.cmpi ne, %16, %c0_i32_11 : i32
    scf.if %17 {
      %c0_12 = arith.constant 0 : index
      %c0_13 = arith.constant 0 : index
      %18 = vector.load %arg6[%c0_12, %c0_13] : memref<18x128xf32, #tpu.memory_space<vmem>>, vector<18x128xf32>
      %cst_14 = arith.constant dense<0.000000e+00> : vector<18xf32>
      %19 = vector.multi_reduction <add>, %18, %cst_14 [1] : vector<18x128xf32> to vector<18xf32>
      %20 = vector.shape_cast %19 : vector<18xf32> to vector<18x1xf32>
      %21 = vector.shape_cast %20 : vector<18x1xf32> to vector<1x1x18x1xf32>
      %c0_15 = arith.constant 0 : index
      %c0_16 = arith.constant 0 : index
      %c0_17 = arith.constant 0 : index
      %c0_18 = arith.constant 0 : index
      %22 = vector.load %arg5[%c0_15, %c0_16, %c0_17, %c0_18] : memref<1x1x18x1xf32, #tpu.memory_space<vmem>>, vector<1x1x18x1xf32>
      tpu.vector_store %arg5[%c0_15, %c0_16, %c0_17, %c0_18], %21 {strides = array<i32>} : memref<1x1x18x1xf32, #tpu.memory_space<vmem>>, vector<1x1x18x1xf32>,
    } else {
    }
    return
  }
  func.func @transform_0(%arg0: i32, %arg1: i32, %arg2: i32) -> (i32, i32, i32) {
    %c1_i32 = arith.constant 1 : i32
    %0 = arith.muli %arg1, %c1_i32 : i32
    %1 = arith.addi %0, %arg2 : i32
    %c0_i32 = arith.constant 0 : i32
    %c0_i32_0 = arith.constant 0 : i32
    return %arg0, %c0_i32, %1 : i32, i32, i32
  }
  func.func @transform_1(%arg0: i32, %arg1: i32, %arg2: i32) -> (i32, i32, i32) {
    %c1_i32 = arith.constant 1 : i32
    %0 = arith.muli %arg1, %c1_i32 : i32
    %1 = arith.addi %0, %arg2 : i32
    %c0_i32 = arith.constant 0 : i32
    %c0_i32_0 = arith.constant 0 : i32
    return %arg0, %c0_i32, %1 : i32, i32, i32
  }
  func.func @transform_2(%arg0: i32, %arg1: i32, %arg2: i32) -> (i32, i32, i32, i32) {
    %c0_i32 = arith.constant 0 : i32
    %c0_i32_0 = arith.constant 0 : i32
    %c0_i32_1 = arith.constant 0 : i32
    return %arg0, %arg1, %c0_i32, %c0_i32_0 : i32, i32, i32, i32
  }
}

</mosaic_0001>

<bundles_post_ra>
// kernel: tpu_custom_call.1
= control target key start
LH: loop header
LB: loop body
LE: loop exit
PB: predicated region body
PF: predicated region fallthrough
CT: control target
= control target key end

     0   :  { %s453_s9 = smov 0   ;;  %s455_s10 = smov 0   ;;  %s489_s0 = inlined_call_operand.vmem [shape: f32[2,18,8], index: 0, kind: input, shape index: {}]   ;;  %s490_s1 = inlined_call_operand.vmem [shape: s32[2,1,128], index: 1, kind: input, shape index: {}]   ;;  %s491_s2 = inlined_call_operand.vmem [shape: f32[2,1,18,1], index: 2, kind: output, shape index: {}]  }
   0x1   :  { %s457_s11 = smov 0  }
   0x2 LB: > { %s31_s12 = sadd.s32 1, %s431_s10  ;;  %p381_p0 = scmp.ge.s32.totalorder %s435_s11, 1  ;;  %s435_s11 = sphi %s457_s11, %s12_s11   ;;  %s431_s10 = sphi %s455_s10, %s493_s10   ;;  %s427_s9 = sphi %s453_s9, %s492_s9  }
   0x3   : > { %p33_p1 = scmp.ge.s32.totalorder %s31_s12, 2  ;;  %p159_p2 = scmp.lt.s32.totalorder %s435_s11, 3 }
   0x5   : > { %s495_s12 = smov (%p33_p1, %s31_s12), 0  ;;  %p160_p3 = pnand %p381_p0, %p159_p2 }
   0x6   : > { %p197_p4 = scmp.lt.s32.totalorder (!%p160_p3), %s427_s9, 1 }
   0x7   : > { %163 = sbr.rel (%p160_p3) target bundleno = 149 (0x95), region = 28 }
   0xc   : > { %v234_v0 = vlaneseq  ;;  %v437_v1 = vmov 0.0   ;;  %s497_s9 = smov (!%p197_p4, %s427_s9), 1  ;;  %vm264_vm3 = vcmask 1041408   ;;  %vm268_vm4 = vcmask 7168  }
   0xd   : > { %229 = vst [vmem:[#allocation2 + $0x8] sm:$0x3] %v437_v1  ;;  %s386_s13 = smul.u32 24, %s497_s9  ;;  %s212_s16 = scalar_lea.vmem %s490_s1, %s497_s9  ;;  %vm271_vm5 = vcmask 1024  }
   0xe   : > { %v235_v2 = vshrl.u32 %v234_v0, 7  ;;  %v412_v5 = vld [vmem:[%s212_s16] ss:$0 sm:$0xff] }
   0xf   : > { %s204_s19 = scalar_lea.vmem %s489_s0, %s386_s13  ;;  %s222_s22 = scalar_lea.vmem %s491_s2, %s386_s13 }
  0x10   : > { %v237_v3 = vadd.s32 16, %v235_v2  ;;  %v236_v4 = vadd.s32 8, %v235_v2  ;;  %v230_v6 = vld [vmem:[%s204_s19] sm:$0xff]  ;;  %vm239_vm0 = vcmp.eq.s32.totalorder %v235_v2, %v412_v5  ;;  %v232_v7 = vld [vmem:[%s204_s19 + $0x10] sm:$0x3]  ;;  %v231_v8 = vld [vmem:[%s204_s19 + $0x8] sm:$0xff] }
  0x11   : > { %v245_v9 = vsel %vm239_vm0, %v230_v6, 0.0 }
  0x12   : > { %vm241_vm1 = vcmp.eq.s32.totalorder %v237_v3, %v412_v5  ;;  %vm240_vm2 = vcmp.eq.s32.totalorder %v236_v4, %v412_v5  ;;  %260 = vadd.xlane.f32.xlu0 %v245_v9 }
  0x13   : > { %v247_v11 = vsel %vm241_vm1, %v232_v7, 0.0  ;;  %v246_v12 = vsel %vm240_vm2, %v231_v8, 0.0 }
  0x14   : > { %v244_v10 = vld [vmem:[#allocation2 + $0x8] sm:$0x3] }
  0x15   : > { %v250_v13 = vadd.f32 %v247_v11, %v244_v10 }
  0x17   : > { %253 = vst [vmem:[#allocation2 + $0x8] sm:$0x3] %v250_v13 }
  0x1a   : > { %262 = vadd.xlane.f32.xlu0 %v246_v12 }
  0x1e   : > { %v259_v14 = vld [vmem:[#allocation2 + $0x8] sm:$0x3] }
  0x1f   : > { %v265_v15 = vsel %vm264_vm3, %v259_v14, 0.0 }
  0x20   : > { %266 = vadd.xlane.f32.xlu1 %v265_v15 }
  0x85   : > { %v261_v16 = vpop.xlane.xlu0 %260 }
  0x86   : > { %269 = vst.msk [vmem:[%s222_s22] sm:$0xff] %vm268_vm4, %v261_v16 }
  0x8d   : > { %v263_v17 = vpop.xlane.xlu0 %262 }
  0x8e   : > { %270 = vst.msk [vmem:[%s222_s22 + $0x8] sm:$0xff] %vm268_vm4, %v263_v17 }
  0x93   : > { %v267_v18 = vpop.xlane.xlu1 %266 }
  0x94   : > { %272 = vst.msk [vmem:[%s222_s22 + $0x10] sm:$0x3] %vm271_vm5, %v267_v18 }
  0x95 PF: > { %s12_s11 = sadd.s32 1, %s435_s11   ;;  %s492_s9 = smov %s431_s10 }
  0x96   : > { %p9_p5 = scmp.ge.s32.totalorder %s12_s11, 4   ;;  %s493_s10 = smov %s495_s12 }
  0x98   :  { %11 = sbr.rel (!%p9_p5) target bundleno = 2 (0x2), region = 69 }

</bundles_post_ra>
